<compile_context>
chip_gen: v7x
topology: tpu7x:2x2x1
jax: 0.10.0
libtpu: 0.0.40
codegen_flags: <defaults>
</compile_context>

<pallas_src>
import functools

import jax
import jax.numpy as jnp
from jax.experimental import pallas as pl
from jax.experimental.pallas import tpu as pltpu

LN_EPS = 1e-5
LANE = 128
WEIGHT_BLOCK_BUDGET_BYTES = 12 * 1024 * 1024   # per-step weight block (all buffers)
VMEM_LIMIT_BYTES = 32 * 1024 * 1024            # explicit, safe on v5e/v6e/v7x


def _round_up(x, m):
    return ((x + m - 1) // m) * m


def _cdiv(a, b):
    return (a + b - 1) // b


def _fused_group_kernel(G, num_extra, a_pad,
                        x_ref, w1_ref, b1_ref, gamma_ref, beta_ref, *rest):
    """One grid step = one group of G attribute heads.

    rest = ([wh_l, bh_l] * num_extra, w2, b2, out)
      x_ref     : (B, D) bf16, resident (constant index_map)
      w1_ref    : (G, D, H) bf16 block (pipelined per group)
      b1/gamma/beta/bh/b2 refs : full (NH_pad, ...) f32 slabs, resident,
                                 indexed with pl.program_id(0)*G + i
      w2_ref    : (G, H, A_pad) bf16 block
      o_ref     : (B, G*A_pad) f32 lane-dense output block
    """
    extra = rest[:2 * num_extra]
    w2_ref, b2_ref, o_ref = rest[2 * num_extra:]

    g = pl.program_id(0)
    x = x_ref[...]                                   # (B, D) bf16, cast done in wrapper

    for i in range(G):                               # static unroll over heads in group
        head = g * G + i                             # row into the resident param slabs

        # Linear(clip_dim -> hidden): bf16 MXU inputs, f32 accumulation.
        h = jnp.dot(x, w1_ref[i], preferred_element_type=jnp.float32)
        h = h + b1_ref[pl.ds(head, 1), :]

        # LayerNorm (f32 math), gamma folded into the rsqrt scale, ReLU fused.
        mean = jnp.mean(h, axis=-1, keepdims=True)
        cent = h - mean
        var = jnp.mean(cent * cent, axis=-1, keepdims=True)
        scale = jax.lax.rsqrt(var + LN_EPS) * gamma_ref[pl.ds(head, 1), :]
        r = jnp.maximum(cent * scale + beta_ref[pl.ds(head, 1), :], 0.0)

        # Extra hidden blocks: Linear -> ReLU (Dropout = identity at inference).
        for l in range(num_extra):
            wh_ref = extra[2 * l]
            bh_ref = extra[2 * l + 1]
            r = jnp.dot(r.astype(jnp.bfloat16), wh_ref[i],
                        preferred_element_type=jnp.float32)
            r = jnp.maximum(r + bh_ref[pl.ds(head, 1), :], 0.0)

        # Final Linear(hidden -> attr_dim_padded): lane-dense store.
        out = jnp.dot(r.astype(jnp.bfloat16), w2_ref[i],
                      preferred_element_type=jnp.float32)
        out = out + b2_ref[pl.ds(head, 1), :]
        o_ref[:, i * a_pad:(i + 1) * a_pad] = out


def _run_category(x_bf16, st):
    """Run all attribute heads of one category in a single fused pallas_call."""
    w1 = st["w1"]          # (NH_pad, D, H)      bf16
    b1 = st["b1"]          # (NH_pad, H)         f32   resident
    gamma = st["gamma"]    # (NH_pad, H)         f32   resident
    beta = st["beta"]      # (NH_pad, H)         f32   resident
    extras = st["extras"]  # [(NH_pad, H, H) bf16, (NH_pad, H) f32] per extra layer
    w2 = st["w2"]          # (NH_pad, H, A_pad)  bf16
    b2 = st["b2"]          # (NH_pad, A_pad)     f32   resident

    G = st["group_size"]
    n_groups = st["n_groups"]
    NH_pad, D, H = w1.shape
    A_pad = w2.shape[2]
    B = x_bf16.shape[0]
    nbuf = 3 if n_groups >= 3 else 2   # deepen weight pipeline only when useful

    def resident(arr):
        n = arr.ndim
        return pl.BlockSpec(tuple(arr.shape), lambda g, _n=n: (0,) * _n)

    def grouped(arr):
        block = (G,) + tuple(arr.shape[1:])
        n = arr.ndim - 1
        if nbuf > 2:
            return pl.BlockSpec(block, lambda g, _n=n: (g,) + (0,) * _n,
                                pipeline_mode=pl.Buffered(nbuf))
        return pl.BlockSpec(block, lambda g, _n=n: (g,) + (0,) * _n)

    operands = [x_bf16, w1, b1, gamma, beta]
    in_specs = [resident(x_bf16), grouped(w1),
                resident(b1), resident(gamma), resident(beta)]
    for (wh, bh) in extras:
        operands += [wh, bh]
        in_specs += [grouped(wh), resident(bh)]
    operands += [w2, b2]
    in_specs += [grouped(w2), resident(b2)]

    kernel = functools.partial(_fused_group_kernel, G, len(extras), A_pad)

    return pl.pallas_call(
        kernel,
        out_shape=jax.ShapeDtypeStruct((B, NH_pad * A_pad), jnp.float32),
        grid=(n_groups,),
        in_specs=in_specs,
        out_specs=pl.BlockSpec((B, G * A_pad), lambda g: (0, g)),
        compiler_params=pltpu.CompilerParams(
            dimension_semantics=("parallel",),        # v7x 2-TC sharding
            vmem_limit_bytes=VMEM_LIMIT_BYTES),
    )(*operands)


class CategoryAwareAttributePredictorPallas:
    """JAX/Pallas port of CategoryAwareAttributePredictor (inference only)."""

    def __init__(self, clip_dim=512, category_attributes=None, attribute_dims=None,
                 hidden_dim=512, dropout_rate=0.2, num_hidden_layers=1, seed=0):
        self.category_attributes = category_attributes
        self.clip_dim = clip_dim
        self.hidden_dim = hidden_dim
        self.num_hidden_layers = num_hidden_layers
        # Per-head params kept for the pure-JAX reference check.
        self.params = {}            # key -> (w1,b1,gamma,beta,extras,w2,b2,attr_dim)
        self.category_stacked = {}  # category -> stacked tensors for the fused kernel

        key = jax.random.PRNGKey(seed)
        for category, attributes in category_attributes.items():
            keys_in_cat = []
            for attr_name in attributes.keys():
                k = f"{category}_{attr_name}"
                if k not in attribute_dims:
                    continue
                out_dim = attribute_dims[k]
                key, k1, k2, k3 = jax.random.split(key, 4)
                # Weights stored [in, out] (pre-transposed vs. PyTorch), bf16.
                w1 = (jax.random.normal(k1, (clip_dim, hidden_dim), jnp.float32)
                      * (1.0 / jnp.sqrt(clip_dim))).astype(jnp.bfloat16)
                b1 = jnp.zeros((1, hidden_dim), jnp.float32)
                gamma = jnp.ones((1, hidden_dim), jnp.float32)
                beta = jnp.zeros((1, hidden_dim), jnp.float32)
                extra_pairs = []
                for _ in range(num_hidden_layers - 1):
                    key, ke = jax.random.split(key)
                    wh = (jax.random.normal(ke, (hidden_dim, hidden_dim), jnp.float32)
                          * (1.0 / jnp.sqrt(hidden_dim))).astype(jnp.bfloat16)
                    bh = jnp.zeros((1, hidden_dim), jnp.float32)
                    extra_pairs.append((wh, bh))
                w2 = (jax.random.normal(k2, (hidden_dim, out_dim), jnp.float32)
                      * (1.0 / jnp.sqrt(hidden_dim))).astype(jnp.bfloat16)
                b2 = (jax.random.normal(k3, (1, out_dim), jnp.float32) * 0.01)
                self.params[k] = (w1, b1, gamma, beta, extra_pairs, w2, b2, out_dim)
                keys_in_cat.append(k)
            if keys_in_cat:
                self.category_stacked[category] = self._stack_category(keys_in_cat)

    def _stack_category(self, keys_in_cat):
        H = self.hidden_dim
        D = self.clip_dim
        E = self.num_hidden_layers - 1
        NH = len(keys_in_cat)
        max_a = max(self.params[k][7] for k in keys_in_cat)
        a_pad = max(LANE, _round_up(max_a, LANE))     # lane-dense output width

        # Head-group size: keep the per-step weight block (worst case 3 pipeline
        # buffers) under the VMEM budget, and keep >= 2 grid steps when NH >= 2
        # so v7x's two TensorCores both get work.
        per_head_w_bytes = 2 * (D * H + E * H * H + H * a_pad)          # bf16
        max_g_vmem = max(1, WEIGHT_BLOCK_BUDGET_BYTES // (3 * per_head_w_bytes))
        G = max(1, min(max_g_vmem, _cdiv(NH, 2))) if NH >= 2 else 1
        n_groups = _cdiv(NH, G)
        NH_pad = n_groups * G

        w1s, b1s, gs, bs, w2s, b2s = [], [], [], [], [], []
        extra_ws = [[] for _ in range(E)]
        extra_bs = [[] for _ in range(E)]
        for k in keys_in_cat:
            w1, b1, gamma, beta, extra_pairs, w2, b2, a = self.params[k]
            w1s.append(w1)
            b1s.append(b1[0])
            gs.append(gamma[0])
            bs.append(beta[0])
            for i, (wh, bh) in enumerate(extra_pairs):
                extra_ws[i].append(wh)
                extra_bs[i].append(bh[0])
            w2s.append(jnp.zeros((H, a_pad), jnp.bfloat16).at[:, :a].set(w2))
            b2s.append(jnp.zeros((a_pad,), jnp.float32).at[:a].set(b2[0]))
        # Zero-weight dummy heads pad the last group (outputs sliced off later).
        for _ in range(NH_pad - NH):
            w1s.append(jnp.zeros((D, H), jnp.bfloat16))
            b1s.append(jnp.zeros((H,), jnp.float32))
            gs.append(jnp.ones((H,), jnp.float32))
            bs.append(jnp.zeros((H,), jnp.float32))
            for i in range(E):
                extra_ws[i].append(jnp.zeros((H, H), jnp.bfloat16))
                extra_bs[i].append(jnp.zeros((H,), jnp.float32))
            w2s.append(jnp.zeros((H, a_pad), jnp.bfloat16))
            b2s.append(jnp.zeros((a_pad,), jnp.float32))

        extras = [(jnp.stack(extra_ws[i]), jnp.stack(extra_bs[i])) for i in range(E)]
        return dict(
            keys=keys_in_cat,
            attr_dims=[self.params[k][7] for k in keys_in_cat],
            a_pad=a_pad, group_size=G, n_groups=n_groups,
            w1=jnp.stack(w1s), b1=jnp.stack(b1s),
            gamma=jnp.stack(gs), beta=jnp.stack(bs),
            extras=extras,
            w2=jnp.stack(w2s), b2=jnp.stack(b2s),
        )

    def __call__(self, clip_features, category):
        results = {}
        if category not in self.category_stacked:
            return results
        st = self.category_stacked[category]
        # Single bf16 cast in the wrapper (kernel no longer casts per head).
        x_bf16 = clip_features.astype(jnp.bfloat16)
        out = _run_category(x_bf16, st)                  # (B, NH_pad*A_pad) f32
        a_pad = st["a_pad"]
        for h, k in enumerate(st["keys"]):
            a = st["attr_dims"][h]
            results[k] = out[:, h * a_pad: h * a_pad + a]   # static lane slice
        return results


def _reference_head(x, head_params):
    """Pure-JAX reference (mirrors the kernel's bf16 weights / f32 accumulation)."""
    w1, b1, gamma, beta, extra_pairs, w2, b2, _ = head_params
    xb = x.astype(jnp.bfloat16).astype(jnp.float32)
    h = xb @ w1.astype(jnp.float32) + b1
    mean = jnp.mean(h, axis=-1, keepdims=True)
    var = jnp.mean((h - mean) ** 2, axis=-1, keepdims=True)
    h = (h - mean) / jnp.sqrt(var + LN_EPS) * gamma + beta
    h = jnp.maximum(h, 0.0)
    for (wh, bh) in extra_pairs:
        h = h.astype(jnp.bfloat16).astype(jnp.float32) @ wh.astype(jnp.float32) + bh
        h = jnp.maximum(h, 0.0)
    return h.astype(jnp.bfloat16).astype(jnp.float32) @ w2.astype(jnp.float32) + b2


if __name__ == "__main__":
    # Small, TPU-friendly shapes (feature dims lane-aligned, batch sublane-aligned).
    B = 8
    CLIP_DIM = 128
    HIDDEN_DIM = 128

    key = jax.random.PRNGKey(0)
    clip_features = jax.random.normal(key, (B, CLIP_DIM), jnp.float32)

    ok = True

    # Config 1: num_hidden_layers=1, multi-head and single-head categories.
    category_attributes = {
        "shirt": {"color": None, "sleeve_length": None},
        "pants": {"fit": None},
    }
    attribute_dims = {"shirt_color": 16, "shirt_sleeve_length": 8, "pants_fit": 8}
    model1 = CategoryAwareAttributePredictorPallas(
        clip_dim=CLIP_DIM, category_attributes=category_attributes,
        attribute_dims=attribute_dims, hidden_dim=HIDDEN_DIM,
        dropout_rate=0.2, num_hidden_layers=1, seed=0)

    expected = {
        "shirt": {"shirt_color": (B, 16), "shirt_sleeve_length": (B, 8)},
        "pants": {"pants_fit": (B, 8)},
    }
    for category in ("shirt", "pants"):
        results = model1(clip_features, category)
        results = jax.tree_util.tree_map(jax.block_until_ready, results)
        if set(results.keys()) != set(expected[category].keys()):
            ok = False
        for k, out in results.items():
            ref = _reference_head(clip_features, model1.params[k])
            if out.shape != expected[category][k]:
                ok = False
            if not jnp.allclose(out, ref, atol=1e-2, rtol=1e-2):
                ok = False

    # Config 2: num_hidden_layers=2 exercises the extra Linear+ReLU blocks.
    model2 = CategoryAwareAttributePredictorPallas(
        clip_dim=CLIP_DIM,
        category_attributes={"jacket": {"style": None, "zipper": None}},
        attribute_dims={"jacket_style": 12, "jacket_zipper": 4},
        hidden_dim=HIDDEN_DIM, dropout_rate=0.2, num_hidden_layers=2, seed=1)
    results = model2(clip_features, "jacket")
    results = jax.tree_util.tree_map(jax.block_until_ready, results)
    for k, out in results.items():
        ref = _reference_head(clip_features, model2.params[k])
        if out.shape != ref.shape:
            ok = False
        if not jnp.allclose(out, ref, atol=1e-2, rtol=1e-2):
            ok = False

    print("KERNEL_OK" if ok else "KERNEL_MISMATCH")
</pallas_src>

<mosaic_0001>
module attributes {stable_mosaic.version = 11 : i64} {
  func.func @_fused_group_kernel(%arg0: i32, %arg1: memref<8x128xbf16, #tpu.memory_space<vmem>>, %arg2: memref<1x128x128xbf16, #tpu.memory_space<vmem>>, %arg3: memref<2x128xf32, #tpu.memory_space<vmem>>, %arg4: memref<2x128xf32, #tpu.memory_space<vmem>>, %arg5: memref<2x128xf32, #tpu.memory_space<vmem>>, %arg6: memref<1x128x128xbf16, #tpu.memory_space<vmem>>, %arg7: memref<2x128xf32, #tpu.memory_space<vmem>>, %arg8: memref<8x128xf32, #tpu.memory_space<vmem>>) attributes {dimension_semantics = [#tpu.dimension_semantics<parallel>], iteration_bounds = array<i64: 2>, scalar_prefetch = 0 : i64, scratch_operands = 0 : i64, tpu.core_type = #tpu.core_type<tc>, window_params = [{pipeline_mode = #tpu.pipeline_mode<synchronous>, transform_indices = @transform_0, window_bounds = array<i64: 8, 128>}, {transform_indices = @transform_1, window_bounds = array<i64: 1, 128, 128>}, {pipeline_mode = #tpu.pipeline_mode<synchronous>, transform_indices = @transform_2, window_bounds = array<i64: 2, 128>}, {pipeline_mode = #tpu.pipeline_mode<synchronous>, transform_indices = @transform_3, window_bounds = array<i64: 2, 128>}, {pipeline_mode = #tpu.pipeline_mode<synchronous>, transform_indices = @transform_4, window_bounds = array<i64: 2, 128>}, {transform_indices = @transform_5, window_bounds = array<i64: 1, 128, 128>}, {pipeline_mode = #tpu.pipeline_mode<synchronous>, transform_indices = @transform_6, window_bounds = array<i64: 2, 128>}, {transform_indices = @transform_7, window_bounds = array<i64: 8, 128>}]} {
    %c0 = arith.constant 0 : index
    %c0_0 = arith.constant 0 : index
    %0 = vector.load %arg1[%c0, %c0_0] : memref<8x128xbf16, #tpu.memory_space<vmem>>, vector<8x128xbf16>
    %c1_i32 = arith.constant 1 : i32
    %1 = arith.muli %arg0, %c1_i32 : i32
    %c0_i32 = arith.constant 0 : i32
    %2 = arith.addi %1, %c0_i32 : i32
    %c0_1 = arith.constant 0 : index
    %c0_2 = arith.constant 0 : index
    %c0_3 = arith.constant 0 : index
    %3 = vector.load %arg2[%c0_1, %c0_2, %c0_3] : memref<1x128x128xbf16, #tpu.memory_space<vmem>>, vector<1x128x128xbf16>
    %4 = vector.shape_cast %3 : vector<1x128x128xbf16> to vector<128x128xbf16>
    %cst = arith.constant dense<0.000000e+00> : vector<8x128xf32>
    %5 = tpu.matmul %0, %4, %cst {dimension_numbers = #tpu.dot_dimension_numbers<[1], [0], [0], [1], [0, 0, 1, 1], [], []>} : vector<8x128xbf16>, vector<128x128xbf16>, vector<8x128xf32> -> vector<8x128xf32>
    %6 = arith.index_cast %2 : i32 to index
    %c0_4 = arith.constant 0 : index
    %7 = vector.load %arg3[%6, %c0_4] : memref<2x128xf32, #tpu.memory_space<vmem>>, vector<1x128xf32>
    %8 = vector.broadcast %7 : vector<1x128xf32> to vector<8x128xf32>
    %9 = arith.addf %5, %8 : vector<8x128xf32>
    %cst_5 = arith.constant dense<0.000000e+00> : vector<8xf32>
    %10 = vector.multi_reduction <add>, %9, %cst_5 [1] : vector<8x128xf32> to vector<8xf32>
    %11 = vector.shape_cast %10 : vector<8xf32> to vector<8x1xf32>
    %cst_6 = arith.constant 1.280000e+02 : f32
    %12 = vector.broadcast %cst_6 : f32 to vector<8x1xf32>
    %13 = arith.divf %11, %12 : vector<8x1xf32>
    %14 = vector.broadcast %13 : vector<8x1xf32> to vector<8x128xf32>
    %15 = arith.subf %9, %14 : vector<8x128xf32>
    %16 = arith.mulf %15, %15 : vector<8x128xf32>
    %cst_7 = arith.constant dense<0.000000e+00> : vector<8xf32>
    %17 = vector.multi_reduction <add>, %16, %cst_7 [1] : vector<8x128xf32> to vector<8xf32>
    %18 = vector.shape_cast %17 : vector<8xf32> to vector<8x1xf32>
    %cst_8 = arith.constant 1.280000e+02 : f32
    %19 = vector.broadcast %cst_8 : f32 to vector<8x1xf32>
    %20 = arith.divf %18, %19 : vector<8x1xf32>
    %cst_9 = arith.constant 9.99999974E-6 : f32
    %21 = vector.broadcast %cst_9 : f32 to vector<8x1xf32>
    %22 = arith.addf %20, %21 : vector<8x1xf32>
    %23 = math.rsqrt %22 : vector<8x1xf32>
    %24 = arith.index_cast %2 : i32 to index
    %c0_10 = arith.constant 0 : index
    %25 = vector.load %arg4[%24, %c0_10] : memref<2x128xf32, #tpu.memory_space<vmem>>, vector<1x128xf32>
    %26 = vector.broadcast %23 : vector<8x1xf32> to vector<8x128xf32>
    %27 = vector.broadcast %25 : vector<1x128xf32> to vector<8x128xf32>
    %28 = arith.mulf %26, %27 : vector<8x128xf32>
    %29 = arith.mulf %15, %28 : vector<8x128xf32>
    %30 = arith.index_cast %2 : i32 to index
    %c0_11 = arith.constant 0 : index
    %31 = vector.load %arg5[%30, %c0_11] : memref<2x128xf32, #tpu.memory_space<vmem>>, vector<1x128xf32>
    %32 = vector.broadcast %31 : vector<1x128xf32> to vector<8x128xf32>
    %33 = arith.addf %29, %32 : vector<8x128xf32>
    %cst_12 = arith.constant 0.000000e+00 : f32
    %34 = vector.broadcast %cst_12 : f32 to vector<8x128xf32>
    %35 = arith.maximumf %33, %34 : vector<8x128xf32>
    %36 = arith.truncf %35 : vector<8x128xf32> to vector<8x128xbf16>
    %c0_13 = arith.constant 0 : index
    %c0_14 = arith.constant 0 : index
    %c0_15 = arith.constant 0 : index
    %37 = vector.load %arg6[%c0_13, %c0_14, %c0_15] : memref<1x128x128xbf16, #tpu.memory_space<vmem>>, vector<1x128x128xbf16>
    %38 = vector.shape_cast %37 : vector<1x128x128xbf16> to vector<128x128xbf16>
    %cst_16 = arith.constant dense<0.000000e+00> : vector<8x128xf32>
    %39 = tpu.matmul %36, %38, %cst_16 {dimension_numbers = #tpu.dot_dimension_numbers<[1], [0], [0], [1], [0, 0, 1, 1], [], []>} : vector<8x128xbf16>, vector<128x128xbf16>, vector<8x128xf32> -> vector<8x128xf32>
    %40 = arith.index_cast %2 : i32 to index
    %c0_17 = arith.constant 0 : index
    %41 = vector.load %arg7[%40, %c0_17] : memref<2x128xf32, #tpu.memory_space<vmem>>, vector<1x128xf32>
    %42 = vector.broadcast %41 : vector<1x128xf32> to vector<8x128xf32>
    %43 = arith.addf %39, %42 : vector<8x128xf32>
    %c0_18 = arith.constant 0 : index
    %c0_19 = arith.constant 0 : index
    %44 = vector.load %arg8[%c0_18, %c0_19] : memref<8x128xf32, #tpu.memory_space<vmem>>, vector<8x128xf32>
    tpu.vector_store %arg8[%c0_18, %c0_19], %43 {strides = array<i32>} : memref<8x128xf32, #tpu.memory_space<vmem>>, vector<8x128xf32>,
    return
  }
  func.func @transform_0(%arg0: i32) -> (i32, i32) {
    %c0_i32 = arith.constant 0 : i32
    %c0_i32_0 = arith.constant 0 : i32
    %c0_i32_1 = arith.constant 0 : i32
    return %c0_i32, %c0_i32_0 : i32, i32
  }
  func.func @transform_1(%arg0: i32) -> (i32, i32, i32) {
    %c0_i32 = arith.constant 0 : i32
    %c0_i32_0 = arith.constant 0 : i32
    %c0_i32_1 = arith.constant 0 : i32
    return %arg0, %c0_i32, %c0_i32_0 : i32, i32, i32
  }
  func.func @transform_2(%arg0: i32) -> (i32, i32) {
    %c0_i32 = arith.constant 0 : i32
    %c0_i32_0 = arith.constant 0 : i32
    %c0_i32_1 = arith.constant 0 : i32
    return %c0_i32, %c0_i32_0 : i32, i32
  }
  func.func @transform_3(%arg0: i32) -> (i32, i32) {
    %c0_i32 = arith.constant 0 : i32
    %c0_i32_0 = arith.constant 0 : i32
    %c0_i32_1 = arith.constant 0 : i32
    return %c0_i32, %c0_i32_0 : i32, i32
  }
  func.func @transform_4(%arg0: i32) -> (i32, i32) {
    %c0_i32 = arith.constant 0 : i32
    %c0_i32_0 = arith.constant 0 : i32
    %c0_i32_1 = arith.constant 0 : i32
    return %c0_i32, %c0_i32_0 : i32, i32
  }
  func.func @transform_5(%arg0: i32) -> (i32, i32, i32) {
    %c0_i32 = arith.constant 0 : i32
    %c0_i32_0 = arith.constant 0 : i32
    %c0_i32_1 = arith.constant 0 : i32
    return %arg0, %c0_i32, %c0_i32_0 : i32, i32, i32
  }
  func.func @transform_6(%arg0: i32) -> (i32, i32) {
    %c0_i32 = arith.constant 0 : i32
    %c0_i32_0 = arith.constant 0 : i32
    %c0_i32_1 = arith.constant 0 : i32
    return %c0_i32, %c0_i32_0 : i32, i32
  }
  func.func @transform_7(%arg0: i32) -> (i32, i32) {
    %c0_i32 = arith.constant 0 : i32
    %c0_i32_0 = arith.constant 0 : i32
    return %c0_i32, %arg0 : i32, i32
  }
}

</mosaic_0001>

<bundles_post_ra>
// kernel: tpu_custom_call.1
= control target key start
LH: loop header
LB: loop body
LE: loop exit
PB: predicated region body
PF: predicated region fallthrough
CT: control target
= control target key end

     0   :  { %12 = vsyncpa [#allocation3], 0  ;;  %s1396_s0 = inlined_call_operand.hbm [shape: bf16[8,128], index: 0, kind: input, shape index: {}]   ;;  %s1397_s1 = inlined_call_operand.hbm [shape: bf16[2,128,128], index: 1, kind: input, shape index: {}]   ;;  %s1398_s2 = inlined_call_operand.vmem [shape: f32[2,128], index: 2, kind: input, shape index: {}]   ;;  %s1399_s3 = inlined_call_operand.vmem [shape: f32[2,128], index: 3, kind: input, shape index: {}]   ;;  %s1400_s4 = inlined_call_operand.vmem [shape: f32[2,128], index: 4, kind: input, shape index: {}]   ;;  %s1401_s5 = inlined_call_operand.hbm [shape: bf16[2,128,128], index: 5, kind: input, shape index: {}]   ;;  %s1402_s6 = inlined_call_operand.vmem [shape: f32[2,128], index: 6, kind: input, shape index: {}]   ;;  %s1403_s7 = inlined_call_operand.hbm [shape: f32[8,256], index: 7, kind: output, shape index: {}]  }
   0x1   :  { %13 = vsyncpa [#allocation6], 0 }
   0x2   :  { %15 = vsyncpa [#allocation6 + $0x1], 0 }
   0x3   :  { %16 = vsyncpa [#allocation4], 0 }
   0x4   :  { %18 = vsyncpa [#allocation4 + $0x1], 0  ;;  %s1109_s24 = smov 0   ;;  %s1111_s25 = smov 0  }
   0x5   :  { %s1113_s26 = smov 0   ;;  %s1115_s27 = smov 0  }
   0x6 LB: > { %s1130_s28 = sadd.s32 1, %s1059_s27   ;;  %s52_s29 = sadd.s32 1, %s1055_s26  ;;  %s1059_s27 = sphi %s1115_s27, %s1430_s27   ;;  %s1055_s26 = sphi %s1113_s26, %s1429_s26   ;;  %s1051_s25 = sphi %s1111_s25, %s1428_s25   ;;  %s1047_s24 = sphi %s1109_s24, %s1427_s24  }
   0x7   : > { %s49_s30 = ssub.s32 %s1059_s27, %s1130_s28  ;;  %p59_p0 = scmp.ne.s32.totalorder %s1055_s26, %s1051_s25 }
   0x8   : > { %p50_p1 = scmp.eq.s32.totalorder %s49_s30, 0  ;;  %p60_p2 = scmp.eq.s32.totalorder %s1059_s27, 0 }
   0x9   : > { %p843_p4 = scmp.lt.s32.totalorder %s1059_s27, 2  ;;  %s248_s9 = sand.u32 1, %s1059_s27  }
   0xa   : > { %s1141_s8 = scalar_select %p50_p1, %s1055_s26, %s52_s29  }
   0xb   : > { %p61_p5 = por %p60_p2, %p59_p0  ;;  %s250_s10 = sand.u32 1, %s1055_s26  }
   0xc   : > { %s1148_s11 = sshll.u32 %s250_s10, 6  ;;  %s757_s12 = sshll.u32 %s1059_s27, 10 }
   0xd   : > { %s1156_s15 = scalar_lea.hbm %s1397_s1, %s757_s12  ;;  %s252_s16 = scalar_lea.vmem [#allocation5], %s1148_s11 }
   0xe   : > { %s259_s17 = sshll.u32 %s252_s16, 4  ;;  %p1159_p6 = pnand %p843_p4, %p61_p5  ;;  %s1163_s17 = int_to_ptr.vmem [resolvable:$true] %s259_s17 }
   0xf   : > { %s1165_s19 = scalar_lea.sflag [#allocation6], %s248_s9  ;;  %s901_s20 = scalar_lea.hbm %s1156_s15, 1024 }
  0x10   : > { %p902_p7 = scmp.ne.s32.totalorder %s1156_s15, %s901_s20  ;;  %p903_p8 = pneg %p1159_p6 }
  0x11   : > { %s906_s23 = scalar_lea.hbm %s1397_s1, 2048  ;;  %p907_p11 = scmp.lt.u32.totalorder %s1156_s15, %s1397_s1 }
  0x12   : > { %p904_p9 = pnand %p903_p8, %p902_p7  ;;  %p908_p12 = scmp.lt.u32.totalorder %s906_s23, %s901_s20 }
  0x13   : > { %p910_p1 = scmp.lt.u32.totalorder %s901_s20, %s1156_s15 }
  0x14   : > { %p905_p10 = pneg %p904_p9  ;;  %p909_p13 = por %p908_p12, %p907_p11 }
  0x16   : > { %p911_p2 = por %p910_p1, %p909_p13 }
  0x18   : > { %p912_p4 = pnand %p911_p2, %p905_p10 }
  0x1a   : > { %915 = shalt.err (!%p912_p4)
}
  0x1b   : > { %s916_s9 = scalar_lea.vmem %s1163_s17, 1024  ;;  %s1061_s10 = smov [#allocation5]  }
  0x1c   : > { %p917_p5 = scmp.ne.s32.totalorder %s1163_s17, %s916_s9  ;;  %s921_s13 = sshll.u32 %s1061_s10, 4  ;;  %s922_s13 = int_to_ptr.vmem [resolvable:$false] %s921_s13 }
  0x1d   : > { %s923_s14 = scalar_lea.vmem %s922_s13, 2048  ;;  %p924_p3 = scmp.lt.s32.totalorder %s1163_s17, %s922_s13 }
  0x1e   : > { %p919_p7 = pnand %p917_p5, %p903_p8  ;;  %p925_p11 = scmp.lt.s32.totalorder %s923_s14, %s916_s9 }
  0x20   : > { %p920_p9 = pneg %p919_p7  ;;  %p926_p12 = por %p925_p11, %p924_p3 }
  0x22   : > { %p927_p13 = pnand %p926_p12, %p920_p9 }
  0x24   : > { %930 = shalt.err (!%p927_p13)
}
  0x25   : > { %s1404_s16 = smov 64   ;;  %s1405_s20 = smov 4  }
  0x26   : > { %834 = dma.hbm_to_vmem [thread:$0]  (!%p1159_p6), %s1156_s15, 1024, %s1163_s17, %s1165_s19, %s1404_s16, %s1404_s16, %s1405_s20  }
  0x27   : > { %s273_s21 = scalar_lea.vmem [#allocation7], %s1148_s11  ;;  %s1198_s23 = sadd.s32 4294967295, %s1059_s27  }
  0x28   : > { %s280_s22 = sshll.u32 %s273_s21, 4  ;;  %s718_s29 = sadd.s32 4294967294, %s1059_s27   ;;  %s1231_s22 = int_to_ptr.vmem [resolvable:$true] %s280_s22 }
  0x29   : > { %p65_p3 = scmp.ne.s32.totalorder %s1051_s25, %s1047_s24  ;;  %p1406_p10 = scmp.eq.s32.totalorder %s1198_s23, 0 }
  0x2a   : > { %p199_p1 = scmp.eq.s32.totalorder %s1198_s23, 1  ;;  %p205_p2 = scmp.eq.s32.totalorder %s718_s29, 1 }
  0x2b   : > { %p1207_p4 = por %p1406_p10, %p65_p3  ;;  %p719_p5 = scmp.ge.s32.totalorder %s1059_s27, 1 }
  0x2c   : > { %p1215_p7 = por %p199_p1, %p59_p0  ;;  %p1219_p9 = por %p205_p2, %p65_p3 }
  0x2d   : > { %s1411_s30 = scalar_select %p1207_p4, 1, 0 }
  0x2e   : > { %s1412_s11 = scalar_select %p1215_p7, 1, 0 }
  0x2f   : > { %s1413_s15 = scalar_select %p1219_p9, 1, 0 }
  0x30   : > { %p212_p11 = scmp.lt.s32.totalorder %s1059_s27, 3  ;;  %s1229_s10 = scalar_lea.hbm %s1401_s5, %s757_s12 }
  0x31   : > { %s1064_s14 = smov [#allocation2]   ;;  %s931_s29 = scalar_lea.hbm %s1229_s10, 1024 }
  0x32   : > { %p1233_p0 = pnand %p719_p5, %p212_p11  ;;  %s1237_s21 = sshll.u32 %s1064_s14, 4  ;;  %s226_s21 = int_to_ptr.vmem [resolvable:$true] %s1237_s21 }
  0x33   : > { %p932_p13 = scmp.ne.s32.totalorder %s1229_s10, %s931_s29  ;;  %s936_s9 = scalar_lea.hbm %s1401_s5, 2048 }
  0x34   : > { %s1414_s13 = scalar_select %p1233_p0, 1, 0 }
  0x35   : > { %p934_p3 = pnand %p932_p13, %p903_p8  ;;  %p937_p2 = scmp.lt.u32.totalorder %s1229_s10, %s1401_s5 }
  0x36   : > { %p938_p5 = scmp.lt.u32.totalorder %s936_s9, %s931_s29  ;;  %p940_p10 = scmp.lt.u32.totalorder %s931_s29, %s1229_s10 }
  0x37   : > { %p935_p1 = pneg %p934_p3 }
  0x38   : > { %p939_p11 = por %p938_p5, %p937_p2 }
  0x3a   : > { %p941_p9 = por %p940_p10, %p939_p11 }
  0x3c   : > { %p942_p7 = pnand %p941_p9, %p935_p1 }
  0x3e   : > { %945 = shalt.err (!%p942_p7)
}
  0x3f   : > { %s946_s14 = scalar_lea.vmem %s1231_s22, 1024  ;;  %s1065_s12 = smov [#allocation7]  }
  0x40   : > { %p947_p13 = scmp.ne.s32.totalorder %s1231_s22, %s946_s14  ;;  %s951_s17 = sshll.u32 %s1065_s12, 4  ;;  %s952_s17 = int_to_ptr.vmem [resolvable:$false] %s951_s17 }
  0x41   : > { %s953_s16 = scalar_lea.vmem %s952_s17, 2048  ;;  %p954_p4 = scmp.lt.s32.totalorder %s1231_s22, %s952_s17 }
  0x42   : > { %p949_p3 = pnand %p947_p13, %p903_p8  ;;  %p955_p2 = scmp.lt.s32.totalorder %s953_s16, %s946_s14 }
  0x44   : > { %p950_p12 = pneg %p949_p3  ;;  %p956_p5 = por %p955_p2, %p954_p4 }
  0x46   : > { %p957_p10 = pnand %p956_p5, %p950_p12 }
  0x48   : > { %960 = shalt.err (!%p957_p10)
}
  0x49   : > { %s1415_s20 = smov 4   ;;  %s1416_s29 = smov 64  }
  0x4a   : > { %837 = dma.hbm_to_vmem [thread:$0]  (!%p1159_p6), %s1229_s10, 1024, %s1231_s22, %s1165_s19, %s1416_s29, %s1416_s29, %s1415_s20  }
  0x4b   : > { %p1417_p8 = scmp.eq.s32.totalorder %s1198_s23, 0  ;;  %p1418_p7 = pneg %p1233_p0 }
  0x4c   : > { %s961_s12 = scalar_lea.hbm %s1396_s0, 64 }
  0x4d   : > { %p1274_p9 = pnand %p1418_p7, %p1417_p8  ;;  %p962_p4 = scmp.ne.s32.totalorder %s1396_s0, %s961_s12 }
  0x4e   : > { %p968_p11 = scmp.lt.u32.totalorder %s961_s12, %s1396_s0 }
  0x4f   : > { %p963_p12 = pneg %p1274_p9 }
  0x51   : > { %p964_p6 = pnand %p963_p12, %p962_p4 }
  0x53   : > { %p965_p1 = pneg %p964_p6 }
  0x55   : > { %p970_p13 = pnand %p968_p11, %p965_p1 }
  0x57   : > { %973 = shalt.err (!%p970_p13)
}
  0x58   : > { %s974_s10 = scalar_lea.vmem %s226_s21, 64  ;;  %p982_p10 = scmp.lt.s32.totalorder %s226_s21, %s226_s21 }
  0x59   : > { %p975_p3 = scmp.ne.s32.totalorder %s226_s21, %s974_s10  ;;  %p983_p8 = scmp.lt.s32.totalorder %s974_s10, %s974_s10 }
  0x5b   : > { %p977_p2 = pnand %p975_p3, %p963_p12  ;;  %p984_p7 = por %p983_p8, %p982_p10 }
  0x5d   : > { %p978_p5 = pneg %p977_p2 }
  0x5f   : > { %p985_p0 = pnand %p984_p7, %p978_p5 }
  0x61   : > { %988 = shalt.err (!%p985_p0)
}
  0x62   : > { %830 = dma.hbm_to_vmem [thread:$0]  (!%p1274_p9), %s1396_s0, 64, %s226_s21, [#allocation3]  }
  0x63   : > { %p1420_p4 = scmp.ne.s32.totalorder %s1414_s13, 0 }
  0x64   : > { %p1421_p6 = scmp.eq.s32.totalorder (!%p1420_p4), %s1198_s23, 0 }
  0x65   : > { %292 = sbr.rel (%p1420_p4) target bundleno = 905 (0x389), region = 48 }
  0x6c   : > { %1034 = dma.done.wait (%p1421_p6), [#allocation3], 64   ;;  %p1422_p12 = pmov %p1421_p6 }
  0x6d   : > { %s298_s14 = sand.u32 1, %s1198_s23   ;;  %s1302_s18 = sand.u32 1, %s1051_s25  }
  0x6e   : > { %1036 = vsyncadd (%p1422_p12), [#allocation3], 4294967232  ;;  %s730_s9 = sshll.u32 %s1302_s18, 6  ;;  %s299_s12 = scalar_lea.sflag [#allocation6], %s298_s14 }
  0x6f   : > { %s302_s21 = scalar_lea.vmem [#allocation5], %s730_s9  ;;  %p1423_p0 = scmp.ne.s32.totalorder %s1411_s30, 0 }
  0x71   : > { %1038 = dma.done.wait (%p1423_p0), %s299_s12, 2048  }
  0x72   : > { %1040 = vsyncadd (%p1423_p0), %s299_s12, 4294965248  ;;  %v1066_v0 = vmov 0.0   ;;  %vm1067_vm0 = vmmov 0   ;;  %v883_v1 = vld [vmem:[%s302_s21] sm:$0xff]   ;;  %v884_v2 = vld [vmem:[%s302_s21 + $0x8] sm:$0xff]   ;;  %s365_s17 = scalar_lea.vmem %s1398_s2, %s1198_s23  ;;  %s311_s16 = scalar_lea.vmem [#allocation7], %s730_s9 }
  0x73   : > { %777 = vmatprep.subr.bf16.mxu0 %v1066_v0  ;;  %793 = vmatprep.mubr.msk.bf16.mxu0 %vm1067_vm0, %v1066_v0  ;;  %v885_v3 = vld [vmem:[%s302_s21 + $0x10] sm:$0xff]   ;;  %v886_v4 = vld [vmem:[%s302_s21 + $0x18] sm:$0xff]   ;;  %v887_v5 = vld [vmem:[%s302_s21 + $0x20] sm:$0xff]   ;;  %s470_s10 = scalar_lea.vmem %s1399_s3, %s1198_s23  ;;  %s478_s14 = scalar_lea.vmem %s1400_s4, %s1198_s23 }
  0x74   : > { %797 = vmatprep.subr.bf16.mxu1 %v1066_v0  ;;  %813 = vmatprep.mubr.msk.bf16.mxu1 %vm1067_vm0, %v1066_v0  ;;  %v888_v6 = vld [vmem:[%s302_s21 + $0x28] sm:$0xff]   ;;  %v889_v7 = vld [vmem:[%s302_s21 + $0x30] sm:$0xff]   ;;  %v890_v8 = vld [vmem:[%s302_s21 + $0x38] sm:$0xff]   ;;  %s732_s9 = sshll.u32 %s1302_s18, 3  ;;  %s503_s30 = scalar_lea.vmem %s1402_s6, %s1198_s23 }
  0x75   : > { %778 = vmatpush3.bf16.msra.mxu0 %v883_v1  ;;  %v348_v9 = vld [vmem:[#allocation2] sm:$0xf]  ;;  %v891_v16 = vld [vmem:[%s311_s16] sm:$0xff]   ;;  %v892_v17 = vld [vmem:[%s311_s16 + $0x8] sm:$0xff]   ;;  %s754_s13 = sshll.u32 %s1198_s23, 7  ;;  %s599_s20 = scalar_lea.sflag [#allocation4], %s1302_s18 }
  0x76   : > { %779 = vmatprep.subr.bf16.mxu0 %v1066_v0  ;;  %v733_v10 = vld [vmem:[%s365_s17] ss:$0 sm:$0xff]  ;;  %798 = vmatpush3.bf16.msra.mxu1 %v891_v16  ;;  %v893_v22 = vld [vmem:[%s311_s16 + $0x10] sm:$0xff]   ;;  %v895_v24 = vld [vmem:[%s311_s16 + $0x20] sm:$0xff]   ;;  %s346_s17 = scalar_lea.vmem [#allocation8], %s732_s9  ;;  %p1424_p1 = scmp.ne.s32.totalorder %s1412_s11, 0 }
  0x77   : > { %799 = vmatprep.subr.bf16.mxu1 %v1066_v0  ;;  %v894_v23 = vld [vmem:[%s311_s16 + $0x18] sm:$0xff]   ;;  %v896_v25 = vld [vmem:[%s311_s16 + $0x28] sm:$0xff]   ;;  %v897_v26 = vld [vmem:[%s311_s16 + $0x30] sm:$0xff]   ;;  %s1068_s29 = smov [#allocation8]  }
  0x78   : > { %v898_v27 = vld [vmem:[%s311_s16 + $0x38] sm:$0xff]   ;;  %s612_s16 = sshll.u32 %s346_s17, 4  ;;  %s1354_s16 = int_to_ptr.vmem [resolvable:$true] %s612_s16 }
  0x79   : > { %780 = vmatpush3.bf16.msra.mxu0 %v884_v2  ;;  %v742_v31 = vld [vmem:[%s470_s10] ss:$0 sm:$0xff]  ;;  %s1352_s10 = scalar_lea.hbm %s1403_s7, %s754_s13  ;;  %s989_s23 = scalar_lea.vmem %s1354_s16, 128 }
  0x7a   : > { %781 = vmatprep.subr.bf16.mxu0 %v1066_v0  ;;  %800 = vmatpush3.bf16.msra.mxu1 %v892_v17  ;;  %v743_v34 = vld [vmem:[%s478_s14] ss:$0 sm:$0xff]  ;;  %p990_p9 = scmp.ne.s32.totalorder %s1354_s16, %s989_s23  ;;  %s993_s14 = sshll.u32 %s1068_s29, 4  ;;  %s994_s14 = int_to_ptr.vmem [resolvable:$false] %s993_s14 }
  0x7b   : > { %801 = vmatprep.subr.bf16.mxu1 %v1066_v0  ;;  %v744_v39 = vld [vmem:[%s503_s30] ss:$0 sm:$0xff]  ;;  %s995_s9 = scalar_lea.vmem %s994_s14, 256  ;;  %p996_p3 = scmp.lt.s32.totalorder %s1354_s16, %s994_s14 }
  0x7c   : > { %p991_p11 = pnand %p990_p9, %p1424_p1  ;;  %p997_p2 = scmp.lt.s32.totalorder %s995_s9, %s989_s23 }
  0x7d   : > { %782 = vmatpush3.bf16.msra.mxu0 %v885_v3 }
  0x7e   : > { %783 = vmatprep.subr.bf16.mxu0 %v1066_v0  ;;  %802 = vmatpush3.bf16.msra.mxu1 %v893_v22  ;;  %p992_p13 = pneg %p991_p11  ;;  %p998_p5 = por %p997_p2, %p996_p3 }
  0x7f   : > { %803 = vmatprep.subr.bf16.mxu1 %v1066_v0 }
  0x80   : > { %p999_p10 = pnand %p998_p5, %p992_p13 }
  0x81   : > { %784 = vmatpush3.bf16.msra.mxu0 %v886_v4 }
  0x82   : > { %785 = vmatprep.subr.bf16.mxu0 %v1066_v0  ;;  %804 = vmatpush3.bf16.msra.mxu1 %v894_v23 }
  0x83   : > { %805 = vmatprep.subr.bf16.mxu1 %v1066_v0 }
  0x85   : > { %786 = vmatpush3.bf16.msra.mxu0 %v887_v5 }
  0x86   : > { %787 = vmatprep.subr.bf16.mxu0 %v1066_v0  ;;  %806 = vmatpush3.bf16.msra.mxu1 %v895_v24 }
  0x87   : > { %807 = vmatprep.subr.bf16.mxu1 %v1066_v0 }
  0x89   : > { %788 = vmatpush3.bf16.msra.mxu0 %v888_v6 }
  0x8a   : > { %789 = vmatprep.subr.bf16.mxu0 %v1066_v0  ;;  %808 = vmatpush3.bf16.msra.mxu1 %v896_v25 }
  0x8b   : > { %809 = vmatprep.subr.bf16.mxu1 %v1066_v0 }
  0x8d   : > { %790 = vmatpush3.bf16.msra.mxu0 %v889_v7 }
  0x8e   : > { %791 = vmatprep.subr.bf16.mxu0 %v1066_v0  ;;  %810 = vmatpush3.bf16.msra.mxu1 %v897_v26 }
  0x8f   : > { %811 = vmatprep.subr.bf16.mxu1 %v1066_v0 }
  0x91   : > { %792 = vmatpush3.bf16.msra.mxu0 %v890_v8 }
  0x92   : > { %812 = vmatpush3.bf16.msra.mxu1 %v898_v27 }
  0x94   : > { %794 = vmatmul.mubr.bf16.vlgmr.msra.gmra.mrb[0].mxu0 %v348_v9 }
 0x167   : > { %v453_v11 = vpop.f32.mrb[0].mxu0 }
 0x168   : > { %v454_v12 = vadd.f32 %v733_v10, %v453_v11  ;;  %v795_v13 = vpop.f32.mrb[1].mxu0 }
 0x169   : > { %v456_v14 = vpop.f32.mrb[2].mxu0 }
 0x16a   : > { %459 = vadd.xlane.f32.xlu0 %v454_v12  ;;  %v796_v15 = vpop.f32.mrb[3].mxu0 }
 0x1f7   : > { %v460_v18 = vpop.xlane.xlu0 %459 }
 0x1f8   : > { %v462_v19 = vmul.f32 0.0078125, %v460_v18 }
 0x1fa   : > { %v463_v20 = vsub.f32 %v454_v12, %v462_v19 }
 0x1fc   : > { %v464_v21 = vmul.f32 %v463_v20, %v463_v20 }
 0x1fe   : > { %465 = vadd.xlane.f32.xlu0 %v464_v21 }
 0x28b   : > { %v466_v28 = vpop.xlane.xlu0 %465 }
 0x28c   : > { %v467_v29 = vmul.f32 0.0078125, %v466_v28 }
 0x28e   : > { %v468_v30 = vadd.f32 1e-05, %v467_v29 }
 0x290   : > { %899 = vrsqrt.f32 %v468_v30 }
 0x29a   : > { %v900_v32 = vpop.eup %899 }
 0x29b   : > { %v476_v33 = vmul.f32 %v900_v32, %v742_v31 }
 0x29d   : > { %v477_v35 = vmul.f32 %v476_v33, %v463_v20 }
 0x29f   : > { %v484_v36 = vadd.f32 %v743_v34, %v477_v35 }
 0x2a1   : > { %v485_v37 = vmax.f32 %v484_v36, 0.0 }
 0x2a3   : > { %v486_v38 = vpack.c.bf16 %v485_v37, %v485_v37 }
 0x2a5   : > { %814 = vmatmul.mubr.bf16.vlgmr.msra.gmra.mrb[0].mxu1 %v486_v38 }
 0x378   : > { %v591_v40 = vpop.f32.mrb[0].mxu1 }
 0x379   : > { %v592_v41 = vadd.f32 %v744_v39, %v591_v40  ;;  %v815_v42 = vpop.f32.mrb[1].mxu1 }
 0x37a   : > { %v594_v43 = vpop.f32.mrb[2].mxu1 }
 0x37b   : > { %597 = vst [vmem:[%s346_s17] sm:$0xff] %v592_v41  ;;  %v816_v44 = vpop.f32.mrb[3].mxu1 }
 0x37c   : > { %1002 = shalt.err (!%p999_p10)
}
 0x37d   : > { %s1003_s18 = scalar_lea.hbm %s1352_s10, 128  ;;  %s1007_s30 = scalar_lea.hbm %s1403_s7, 256 }
 0x37e   : > { %p1004_p8 = scmp.ne.s32.totalorder %s1352_s10, %s1003_s18  ;;  %p1008_p6 = scmp.lt.u32.totalorder %s1352_s10, %s1403_s7 }
 0x37f   : > { %p1009_p12 = scmp.lt.u32.totalorder %s1007_s30, %s1003_s18  ;;  %p1011_p9 = scmp.lt.u32.totalorder %s1003_s18, %s1352_s10 }
 0x380   : > { %p1005_p7 = pnand %p1004_p8, %p1424_p1 }
 0x381   : > { %p1010_p0 = por %p1009_p12, %p1008_p6 }
 0x382   : > { %p1006_p4 = pneg %p1005_p7 }
 0x383   : > { %p1012_p11 = por %p1011_p9, %p1010_p0 }
 0x385   : > { %p1013_p13 = pnand %p1012_p11, %p1006_p4 }
 0x387   : > { %1016 = shalt.err (!%p1013_p13)
}
 0x388   : > { %825 = dma.vmem_to_hbm [thread:$0]  (%p1424_p1), %s1354_s16, 128, %s1352_s10, %s599_s20  }
 0x389 PF: > { %s624_s19 = sand.u32 1, %s1047_s24   ;;  %p1425_p3 = scmp.ne.s32.totalorder %s1413_s15, 0 }
 0x38a   : > { %p1426_p2 = scmp.ge.s32.totalorder %s1059_s27, 2  ;;  %s625_s22 = scalar_lea.sflag [#allocation4], %s624_s19 }
 0x38c   : > { %p839_p5 = pnand %p1426_p2, %p1425_p3 }
 0x38e   : > { %1042 = dma.done.wait (!%p839_p5), %s625_s22, 128  }
 0x38f   : > { %1044 = vsyncadd (!%p839_p5), %s625_s22, 4294967168  ;;  %p21_p10 = scmp.ge.s32.totalorder %s1130_s28, 4   ;;  %s1427_s24 = smov %s1051_s25 }
 0x390   : > { %s1428_s25 = smov %s1055_s26  ;;  %s1429_s26 = smov %s1141_s8 }
 0x391   : > { %s1430_s27 = smov %s1130_s28  ;;  %23 = sbr.rel (!%p21_p10) target bundleno = 6 (0x6), region = 113 }
 0x398   :  { %630 = vsyncpa [#allocation3], 1 }
 0x399   :  { %632 = vsyncpa [#allocation3 + $0x1], 1 }
 0x39a   :  { %633 = vsyncpa [#allocation6], 1 }
 0x39b   :  { %635 = vsyncpa [#allocation6 + $0x1], 1 }
 0x39c   :  { %636 = vsyncpa [#allocation4], 1 }
 0x39d   :  { %638 = vsyncpa [#allocation4 + $0x1], 1 }

</bundles_post_ra>
